<compile_context>
chip_gen: v7x
topology: tpu7x:2x2x1
jax: 0.10.0
libtpu: 0.0.40
codegen_flags: <defaults>
</compile_context>

<pallas_src>
import functools

import jax
import jax.numpy as jnp
from jax.experimental import pallas as pl
from jax.experimental.pallas import tpu as pltpu

EPS = 1e-5  # nn.InstanceNorm2d default eps (affine=False, track_running_stats=False)


# ----------------------------- fused Pallas kernel ---------------------------

def _make_basic_block_kernel(*, cin, mid, cout, h, w, k, stride, use_shortcut):
    hw = h * w
    pad = k // 2
    strided = stride != 1
    hout = (h + 2 * pad - k) // stride + 1
    wout = (w + 2 * pad - k) // stride + 1
    hw_out = hout * wout
    halo = pad * w + pad                       # flat halo needed for k x k taps
    left = ((halo + 127) // 128) * 128 if halo else 0   # 128-align the center write
    buf_w = left + hw + left
    offs = [(kh - pad, kw - pad) for kh in range(k) for kw in range(k)]

    def _inorm(y):
        # InstanceNorm2d (affine=False): per-channel, biased variance, one pass.
        inv_n = 1.0 / y.shape[1]
        mean = jnp.sum(y, axis=1, keepdims=True) * inv_n
        m2 = jnp.sum(y * y, axis=1, keepdims=True) * inv_n
        var = jnp.maximum(m2 - mean * mean, 0.0)
        return (y - mean) * jax.lax.rsqrt(var + EPS)

    def kernel(x_ref, wc_ref, w2_ref, w3_ref, *rest):
        if strided:
            sel_ref, o_ref, ybuf, patch = rest
        else:
            o_ref, ybuf, patch = rest

        x = x_ref[0]                                    # (cin, hw) f32
        xb = x.astype(jnp.bfloat16)

        # ---- stage 1 (+ shortcut): fused 1x1 convs, one MXU matmul over x ----
        y = jnp.dot(wc_ref[...], xb, preferred_element_type=jnp.float32)
        if use_shortcut:
            res = y[:cout]                              # shortcut conv, pre-IN
            if strided:
                res = jnp.dot(res, sel_ref[...], preferred_element_type=jnp.float32)
            res = _inorm(res)                           # shortcut: IN, no ReLU
            y1 = y[cout:]                               # (mid, hw)
        else:
            res = x                                     # identity residual
            y1 = y
        y1 = jnp.maximum(_inorm(y1), 0.0)               # (mid, hw)

        # ---- stage 2: k x k conv via in-VMEM im2col (halo scratch + slices) ----
        ybuf[...] = jnp.zeros(ybuf.shape, ybuf.dtype)   # zero padding halo
        ybuf[:, pl.ds(left, hw)] = y1
        if k > 1:
            col = jax.lax.broadcasted_iota(jnp.int32, (1, hw), 1) % w
        for t, (dh, dw) in enumerate(offs):
            sh = ybuf[:, pl.ds(left + dh * w + dw, hw)]
            if dw != 0:  # only the width boundary needs masking (halo covers h)
                mask = ((col + dw >= 0) & (col + dw < w)).astype(jnp.float32)
                sh = sh * mask
            patch[pl.ds(t * mid, mid), :] = sh
        y2 = jnp.dot(w2_ref[...], patch[...].astype(jnp.bfloat16),
                     preferred_element_type=jnp.float32)        # (mid, hw)
        if strided:
            y2 = jnp.dot(y2, sel_ref[...], preferred_element_type=jnp.float32)
        y2 = jnp.maximum(_inorm(y2), 0.0)               # (mid, hw_out)

        # ---- stage 3: 1x1 conv + IN + ReLU, residual add, final ReLU ----
        y3 = jnp.dot(w3_ref[...], y2.astype(jnp.bfloat16),
                     preferred_element_type=jnp.float32)        # (cout, hw_out)
        y3 = jnp.maximum(_inorm(y3), 0.0)
        o_ref[0] = jnp.maximum(y3 + res, 0.0)

    return kernel, hout, wout, buf_w


# --------------------------------- wrapper -----------------------------------

@functools.partial(jax.jit, static_argnames=("in_channels", "out_channels",
                                             "kernel_size", "stride"))
def basic_block_forward(x, params, *, in_channels, out_channels,
                        kernel_size, stride):
    if kernel_size % 2 != 1:
        raise ValueError("kernel_size must be odd (ConvLayer same-style padding).")
    use_shortcut = in_channels != out_channels
    if not use_shortcut and stride != 1:
        raise ValueError("identity residual requires stride == 1 "
                         "(the PyTorch module would also shape-error here).")

    n, cin, h, w = x.shape
    mid = out_channels // 4
    kernel, hout, wout, buf_w = _make_basic_block_kernel(
        cin=cin, mid=mid, cout=out_channels, h=h, w=w, k=kernel_size,
        stride=stride, use_shortcut=use_shortcut)
    hw, hw_out = h * w, hout * wout

    # Weight matrices in the (Cout, K) layout of the kernel; bf16 MXU operands.
    # Conv biases are intentionally unused: InstanceNorm(affine=False) cancels
    # any per-channel bias added before it, so the output is unchanged.
    w1m = params["w1"].reshape(mid, in_channels)
    w3m = params["w3"].reshape(out_channels, mid).astype(jnp.bfloat16)
    w2m = jnp.transpose(params["w2"], (0, 2, 3, 1)).reshape(
        mid, kernel_size * kernel_size * mid).astype(jnp.bfloat16)
    if use_shortcut:
        wsm = params["ws"].reshape(out_channels, in_channels)
        wcm = jnp.concatenate([wsm, w1m], axis=0).astype(jnp.bfloat16)
    else:
        wcm = w1m.astype(jnp.bfloat16)

    x_flat = x.reshape(n, cin, hw).astype(jnp.float32)   # NCHW -> (N, C, HW), free

    in_specs = [
        pl.BlockSpec((1, cin, hw), lambda i: (i, 0, 0)),
        pl.BlockSpec(wcm.shape, lambda i: (0, 0)),
        pl.BlockSpec(w2m.shape, lambda i: (0, 0)),
        pl.BlockSpec(w3m.shape, lambda i: (0, 0)),
    ]
    args = [x_flat, wcm, w2m, w3m]

    if stride != 1:
        # 0/1 spatial selection matrix: full-resolution grid -> strided grid.
        src = ((jnp.arange(hout) * stride)[:, None] * w
               + (jnp.arange(wout) * stride)[None, :]).reshape(-1)
        sel = (jnp.arange(hw)[:, None] == src[None, :]).astype(jnp.float32)
        in_specs.append(pl.BlockSpec((hw, hw_out), lambda i: (0, 0)))
        args.append(sel)

    out = pl.pallas_call(
        kernel,
        out_shape=jax.ShapeDtypeStruct((n, out_channels, hw_out), jnp.float32),
        grid=(n,),
        in_specs=in_specs,
        out_specs=pl.BlockSpec((1, out_channels, hw_out), lambda i: (i, 0, 0)),
        scratch_shapes=[
            pltpu.VMEM((mid, buf_w), jnp.float32),                          # haloed y1
            pltpu.VMEM((kernel_size * kernel_size * mid, hw), jnp.float32), # patches
        ],
        compiler_params=pltpu.CompilerParams(dimension_semantics=("parallel",)),
    )(*args)

    return out.reshape(n, out_channels, hout, wout)      # already NCHW


# ------------------------- params + pure-XLA reference -----------------------

def init_basic_block_params(key, in_channels, out_channels, kernel_size):
    """Deterministic synthetic conv weights (PyTorch OIHW shapes, no biases)."""
    mid = out_channels // 4
    ks = jax.random.split(key, 4)

    def conv_w(k_, cout, cin, ksz):
        bound = 1.0 / jnp.sqrt(cin * ksz * ksz)
        return jax.random.uniform(k_, (cout, cin, ksz, ksz), jnp.float32,
                                  -bound, bound)

    return dict(
        w1=conv_w(ks[0], mid, in_channels, 1),
        w2=conv_w(ks[1], mid, mid, kernel_size),
        w3=conv_w(ks[2], out_channels, mid, 1),
        ws=conv_w(ks[3], out_channels, in_channels, 1),
    )


def basic_block_reference(x, params, *, in_channels, out_channels,
                          kernel_size, stride):
    """Pure-XLA f32 reference of the same forward pass (for a loose check)."""
    pad = kernel_size // 2

    def conv(z, wgt, s, p):
        return jax.lax.conv_general_dilated(
            z, wgt, window_strides=(s, s), padding=[(p, p), (p, p)],
            dimension_numbers=("NCHW", "OIHW", "NCHW"))

    def inorm(z):
        m = jnp.mean(z, axis=(2, 3), keepdims=True)
        v = jnp.mean((z - m) ** 2, axis=(2, 3), keepdims=True)
        return (z - m) * jax.lax.rsqrt(v + EPS)

    o = jax.nn.relu(inorm(conv(x, params["w1"], 1, 0)))
    o = jax.nn.relu(inorm(conv(o, params["w2"], stride, pad)))
    o = jax.nn.relu(inorm(conv(o, params["w3"], 1, 0)))
    if in_channels == out_channels:
        r = x
    else:
        r = inorm(conv(x, params["ws"], stride, 0))
    return jax.nn.relu(o + r)


# ----------------------------------- main ------------------------------------

if __name__ == "__main__":
    IN_CH, OUT_CH, KSIZE, STRIDE = 4, 16, 3, 1
    N, H, W = 2, 16, 16

    key = jax.random.PRNGKey(0)
    kx, kp = jax.random.split(key)
    x = jax.random.normal(kx, (N, IN_CH, H, W), jnp.float32)
    params = init_basic_block_params(kp, IN_CH, OUT_CH, KSIZE)

    y = basic_block_forward(x, params, in_channels=IN_CH, out_channels=OUT_CH,
                            kernel_size=KSIZE, stride=STRIDE)
    y = jax.block_until_ready(y)

    assert y.shape == (N, OUT_CH, H, W)
    assert bool(jnp.all(jnp.isfinite(y)))
    assert bool(jnp.all(y >= 0.0))  # final ReLU

    # Loose correctness check vs pure-XLA reference (kernel uses bf16 MXU operands).
    ref = basic_block_reference(x, params, in_channels=IN_CH, out_channels=OUT_CH,
                                kernel_size=KSIZE, stride=STRIDE)
    assert float(jnp.max(jnp.abs(y - ref))) < 0.3

    print("KERNEL_OK")
</pallas_src>

<mosaic_0001>
module attributes {stable_mosaic.version = 11 : i64} {
  func.func @kernel(%arg0: i32, %arg1: memref<1x4x256xf32, #tpu.memory_space<vmem>>, %arg2: memref<20x4xbf16, #tpu.memory_space<vmem>>, %arg3: memref<4x36xbf16, #tpu.memory_space<vmem>>, %arg4: memref<16x4xbf16, #tpu.memory_space<vmem>>, %arg5: memref<1x16x256xf32, #tpu.memory_space<vmem>>, %arg6: memref<4x512xf32, #tpu.memory_space<vmem>>, %arg7: memref<36x256xf32, #tpu.memory_space<vmem>>) attributes {dimension_semantics = [#tpu.dimension_semantics<parallel>], iteration_bounds = array<i64: 2>, scalar_prefetch = 0 : i64, scratch_operands = 2 : i64, tpu.core_type = #tpu.core_type<tc>, window_params = [{transform_indices = @transform_0, window_bounds = array<i64: 1, 4, 256>}, {pipeline_mode = #tpu.pipeline_mode<synchronous>, transform_indices = @transform_1, window_bounds = array<i64: 20, 4>}, {pipeline_mode = #tpu.pipeline_mode<synchronous>, transform_indices = @transform_2, window_bounds = array<i64: 4, 36>}, {pipeline_mode = #tpu.pipeline_mode<synchronous>, transform_indices = @transform_3, window_bounds = array<i64: 16, 4>}, {transform_indices = @transform_4, window_bounds = array<i64: 1, 16, 256>}]} {
    %c0 = arith.constant 0 : index
    %c0_0 = arith.constant 0 : index
    %c0_1 = arith.constant 0 : index
    %0 = vector.load %arg1[%c0, %c0_0, %c0_1] : memref<1x4x256xf32, #tpu.memory_space<vmem>>, vector<1x4x256xf32>
    %1 = vector.shape_cast %0 : vector<1x4x256xf32> to vector<4x256xf32>
    %2 = arith.truncf %1 : vector<4x256xf32> to vector<4x256xbf16>
    %c0_2 = arith.constant 0 : index
    %c0_3 = arith.constant 0 : index
    %3 = vector.load %arg2[%c0_2, %c0_3] : memref<20x4xbf16, #tpu.memory_space<vmem>>, vector<20x4xbf16>
    %cst = arith.constant dense<0.000000e+00> : vector<20x256xf32>
    %4 = tpu.matmul %3, %2, %cst {dimension_numbers = #tpu.dot_dimension_numbers<[1], [0], [0], [1], [0, 0, 1, 1], [], []>} : vector<20x4xbf16>, vector<4x256xbf16>, vector<20x256xf32> -> vector<20x256xf32>
    %5 = vector.extract_strided_slice %4 {offsets = [0, 0], sizes = [16, 256], strides = [1, 1]} : vector<20x256xf32> to vector<16x256xf32>
    %cst_4 = arith.constant dense<0.000000e+00> : vector<16xf32>
    %6 = vector.multi_reduction <add>, %5, %cst_4 [1] : vector<16x256xf32> to vector<16xf32>
    %7 = vector.shape_cast %6 : vector<16xf32> to vector<16x1xf32>
    %cst_5 = arith.constant 3.906250e-03 : f32
    %8 = vector.broadcast %cst_5 : f32 to vector<16x1xf32>
    %9 = arith.mulf %7, %8 : vector<16x1xf32>
    %10 = arith.mulf %5, %5 : vector<16x256xf32>
    %cst_6 = arith.constant dense<0.000000e+00> : vector<16xf32>
    %11 = vector.multi_reduction <add>, %10, %cst_6 [1] : vector<16x256xf32> to vector<16xf32>
    %12 = vector.shape_cast %11 : vector<16xf32> to vector<16x1xf32>
    %cst_7 = arith.constant 3.906250e-03 : f32
    %13 = vector.broadcast %cst_7 : f32 to vector<16x1xf32>
    %14 = arith.mulf %12, %13 : vector<16x1xf32>
    %15 = arith.mulf %9, %9 : vector<16x1xf32>
    %16 = arith.subf %14, %15 : vector<16x1xf32>
    %cst_8 = arith.constant 0.000000e+00 : f32
    %17 = vector.broadcast %cst_8 : f32 to vector<16x1xf32>
    %18 = arith.maximumf %16, %17 : vector<16x1xf32>
    %19 = vector.broadcast %9 : vector<16x1xf32> to vector<16x256xf32>
    %20 = arith.subf %5, %19 : vector<16x256xf32>
    %cst_9 = arith.constant 9.99999974E-6 : f32
    %21 = vector.broadcast %cst_9 : f32 to vector<16x1xf32>
    %22 = arith.addf %18, %21 : vector<16x1xf32>
    %23 = math.rsqrt %22 : vector<16x1xf32>
    %24 = vector.broadcast %23 : vector<16x1xf32> to vector<16x256xf32>
    %25 = arith.mulf %20, %24 : vector<16x256xf32>
    %26 = vector.extract_strided_slice %4 {offsets = [16, 0], sizes = [4, 256], strides = [1, 1]} : vector<20x256xf32> to vector<4x256xf32>
    %cst_10 = arith.constant dense<0.000000e+00> : vector<4xf32>
    %27 = vector.multi_reduction <add>, %26, %cst_10 [1] : vector<4x256xf32> to vector<4xf32>
    %28 = vector.shape_cast %27 : vector<4xf32> to vector<4x1xf32>
    %cst_11 = arith.constant 3.906250e-03 : f32
    %29 = vector.broadcast %cst_11 : f32 to vector<4x1xf32>
    %30 = arith.mulf %28, %29 : vector<4x1xf32>
    %31 = arith.mulf %26, %26 : vector<4x256xf32>
    %cst_12 = arith.constant dense<0.000000e+00> : vector<4xf32>
    %32 = vector.multi_reduction <add>, %31, %cst_12 [1] : vector<4x256xf32> to vector<4xf32>
    %33 = vector.shape_cast %32 : vector<4xf32> to vector<4x1xf32>
    %cst_13 = arith.constant 3.906250e-03 : f32
    %34 = vector.broadcast %cst_13 : f32 to vector<4x1xf32>
    %35 = arith.mulf %33, %34 : vector<4x1xf32>
    %36 = arith.mulf %30, %30 : vector<4x1xf32>
    %37 = arith.subf %35, %36 : vector<4x1xf32>
    %cst_14 = arith.constant 0.000000e+00 : f32
    %38 = vector.broadcast %cst_14 : f32 to vector<4x1xf32>
    %39 = arith.maximumf %37, %38 : vector<4x1xf32>
    %40 = vector.broadcast %30 : vector<4x1xf32> to vector<4x256xf32>
    %41 = arith.subf %26, %40 : vector<4x256xf32>
    %cst_15 = arith.constant 9.99999974E-6 : f32
    %42 = vector.broadcast %cst_15 : f32 to vector<4x1xf32>
    %43 = arith.addf %39, %42 : vector<4x1xf32>
    %44 = math.rsqrt %43 : vector<4x1xf32>
    %45 = vector.broadcast %44 : vector<4x1xf32> to vector<4x256xf32>
    %46 = arith.mulf %41, %45 : vector<4x256xf32>
    %cst_16 = arith.constant 0.000000e+00 : f32
    %47 = vector.broadcast %cst_16 : f32 to vector<4x256xf32>
    %48 = arith.maximumf %46, %47 : vector<4x256xf32>
    %cst_17 = arith.constant 0.000000e+00 : f32
    %49 = vector.broadcast %cst_17 : f32 to vector<4x512xf32>
    %c0_18 = arith.constant 0 : index
    %c0_19 = arith.constant 0 : index
    %50 = vector.load %arg6[%c0_18, %c0_19] : memref<4x512xf32, #tpu.memory_space<vmem>>, vector<4x512xf32>
    tpu.vector_store %arg6[%c0_18, %c0_19], %49 {strides = array<i32>} : memref<4x512xf32, #tpu.memory_space<vmem>>, vector<4x512xf32>,
    %c0_20 = arith.constant 0 : index
    %c128 = arith.constant 128 : index
    %51 = vector.load %arg6[%c0_20, %c128] : memref<4x512xf32, #tpu.memory_space<vmem>>, vector<4x256xf32>
    tpu.vector_store %arg6[%c0_20, %c128], %48 {strides = array<i32>} : memref<4x512xf32, #tpu.memory_space<vmem>>, vector<4x256xf32>,
    %52 = tpu.iota {dimensions = array<i32: 1>} : vector<1x256xi32>
    %c16_i32 = arith.constant 16 : i32
    %c0_i32 = arith.constant 0 : i32
    %53 = arith.cmpi eq, %c16_i32, %c0_i32 : i32
    %c1_i32 = arith.constant 1 : i32
    %54 = arith.select %53, %c1_i32, %c16_i32 : i32
    %55 = vector.broadcast %54 : i32 to vector<1x256xi32>
    %56 = arith.remsi %52, %55 : vector<1x256xi32>
    %c0_i32_21 = arith.constant 0 : i32
    %57 = vector.broadcast %c0_i32_21 : i32 to vector<1x256xi32>
    %58 = arith.cmpi ne, %56, %57 : vector<1x256xi32>
    %c0_i32_22 = arith.constant 0 : i32
    %59 = vector.broadcast %c0_i32_22 : i32 to vector<1x256xi32>
    %60 = arith.cmpi slt, %56, %59 : vector<1x256xi32>
    %c0_i32_23 = arith.constant 0 : i32
    %61 = arith.cmpi slt, %54, %c0_i32_23 : i32
    %62 = vector.broadcast %61 : i1 to vector<1x256xi1>
    %63 = vector.broadcast %62 : vector<1x256xi1> to vector<1x256xi1>
    %64 = arith.xori %60, %63 : vector<1x256xi1>
    %65 = arith.andi %64, %58 : vector<1x256xi1>
    %66 = vector.broadcast %54 : i32 to vector<1x256xi32>
    %67 = arith.addi %56, %66 : vector<1x256xi32>
    %68 = arith.select %65, %67, %56 : vector<1x256xi1>, vector<1x256xi32>
    %c0_24 = arith.constant 0 : index
    %c111 = arith.constant 111 : index
    %69 = vector.load %arg6[%c0_24, %c111] : memref<4x512xf32, #tpu.memory_space<vmem>>, vector<4x256xf32>
    %c-1_i32 = arith.constant -1 : i32
    %70 = vector.broadcast %c-1_i32 : i32 to vector<1x256xi32>
    %71 = arith.addi %68, %70 : vector<1x256xi32>
    %c0_i32_25 = arith.constant 0 : i32
    %72 = vector.broadcast %c0_i32_25 : i32 to vector<1x256xi32>
    %73 = arith.cmpi sge, %71, %72 : vector<1x256xi32>
    %c-1_i32_26 = arith.constant -1 : i32
    %74 = vector.broadcast %c-1_i32_26 : i32 to vector<1x256xi32>
    %75 = arith.addi %68, %74 : vector<1x256xi32>
    %c16_i32_27 = arith.constant 16 : i32
    %76 = vector.broadcast %c16_i32_27 : i32 to vector<1x256xi32>
    %77 = arith.cmpi slt, %75, %76 : vector<1x256xi32>
    %78 = arith.andi %73, %77 : vector<1x256xi1>
    %79 = arith.extui %78 : vector<1x256xi1> to vector<1x256xi32>
    %80 = arith.sitofp %79 : vector<1x256xi32> to vector<1x256xf32>
    %81 = vector.broadcast %80 : vector<1x256xf32> to vector<4x256xf32>
    %82 = arith.mulf %69, %81 : vector<4x256xf32>
    %c0_28 = arith.constant 0 : index
    %c0_29 = arith.constant 0 : index
    %83 = vector.load %arg7[%c0_28, %c0_29] : memref<36x256xf32, #tpu.memory_space<vmem>>, vector<4x256xf32>
    tpu.vector_store %arg7[%c0_28, %c0_29], %82 {strides = array<i32>} : memref<36x256xf32, #tpu.memory_space<vmem>>, vector<4x256xf32>,
    %c0_30 = arith.constant 0 : index
    %c112 = arith.constant 112 : index
    %84 = vector.load %arg6[%c0_30, %c112] : memref<4x512xf32, #tpu.memory_space<vmem>>, vector<4x256xf32>
    %c4 = arith.constant 4 : index
    %c0_31 = arith.constant 0 : index
    %85 = vector.load %arg7[%c4, %c0_31] : memref<36x256xf32, #tpu.memory_space<vmem>>, vector<4x256xf32>
    tpu.vector_store %arg7[%c4, %c0_31], %84 {strides = array<i32>} : memref<36x256xf32, #tpu.memory_space<vmem>>, vector<4x256xf32>,
    %c0_32 = arith.constant 0 : index
    %c113 = arith.constant 113 : index
    %86 = vector.load %arg6[%c0_32, %c113] : memref<4x512xf32, #tpu.memory_space<vmem>>, vector<4x256xf32>
    %c1_i32_33 = arith.constant 1 : i32
    %87 = vector.broadcast %c1_i32_33 : i32 to vector<1x256xi32>
    %88 = arith.addi %68, %87 : vector<1x256xi32>
    %c0_i32_34 = arith.constant 0 : i32
    %89 = vector.broadcast %c0_i32_34 : i32 to vector<1x256xi32>
    %90 = arith.cmpi sge, %88, %89 : vector<1x256xi32>
    %c1_i32_35 = arith.constant 1 : i32
    %91 = vector.broadcast %c1_i32_35 : i32 to vector<1x256xi32>
    %92 = arith.addi %68, %91 : vector<1x256xi32>
    %c16_i32_36 = arith.constant 16 : i32
    %93 = vector.broadcast %c16_i32_36 : i32 to vector<1x256xi32>
    %94 = arith.cmpi slt, %92, %93 : vector<1x256xi32>
    %95 = arith.andi %90, %94 : vector<1x256xi1>
    %96 = arith.extui %95 : vector<1x256xi1> to vector<1x256xi32>
    %97 = arith.sitofp %96 : vector<1x256xi32> to vector<1x256xf32>
    %98 = vector.broadcast %97 : vector<1x256xf32> to vector<4x256xf32>
    %99 = arith.mulf %86, %98 : vector<4x256xf32>
    %c8 = arith.constant 8 : index
    %c0_37 = arith.constant 0 : index
    %100 = vector.load %arg7[%c8, %c0_37] : memref<36x256xf32, #tpu.memory_space<vmem>>, vector<4x256xf32>
    tpu.vector_store %arg7[%c8, %c0_37], %99 {strides = array<i32>} : memref<36x256xf32, #tpu.memory_space<vmem>>, vector<4x256xf32>,
    %c0_38 = arith.constant 0 : index
    %c127 = arith.constant 127 : index
    %101 = vector.load %arg6[%c0_38, %c127] : memref<4x512xf32, #tpu.memory_space<vmem>>, vector<4x256xf32>
    %c-1_i32_39 = arith.constant -1 : i32
    %102 = vector.broadcast %c-1_i32_39 : i32 to vector<1x256xi32>
    %103 = arith.addi %68, %102 : vector<1x256xi32>
    %c0_i32_40 = arith.constant 0 : i32
    %104 = vector.broadcast %c0_i32_40 : i32 to vector<1x256xi32>
    %105 = arith.cmpi sge, %103, %104 : vector<1x256xi32>
    %c-1_i32_41 = arith.constant -1 : i32
    %106 = vector.broadcast %c-1_i32_41 : i32 to vector<1x256xi32>
    %107 = arith.addi %68, %106 : vector<1x256xi32>
    %c16_i32_42 = arith.constant 16 : i32
    %108 = vector.broadcast %c16_i32_42 : i32 to vector<1x256xi32>
    %109 = arith.cmpi slt, %107, %108 : vector<1x256xi32>
    %110 = arith.andi %105, %109 : vector<1x256xi1>
    %111 = arith.extui %110 : vector<1x256xi1> to vector<1x256xi32>
    %112 = arith.sitofp %111 : vector<1x256xi32> to vector<1x256xf32>
    %113 = vector.broadcast %112 : vector<1x256xf32> to vector<4x256xf32>
    %114 = arith.mulf %101, %113 : vector<4x256xf32>
    %c12 = arith.constant 12 : index
    %c0_43 = arith.constant 0 : index
    %115 = vector.load %arg7[%c12, %c0_43] : memref<36x256xf32, #tpu.memory_space<vmem>>, vector<4x256xf32>
    tpu.vector_store %arg7[%c12, %c0_43], %114 {strides = array<i32>} : memref<36x256xf32, #tpu.memory_space<vmem>>, vector<4x256xf32>,
    %c0_44 = arith.constant 0 : index
    %c128_45 = arith.constant 128 : index
    %116 = vector.load %arg6[%c0_44, %c128_45] : memref<4x512xf32, #tpu.memory_space<vmem>>, vector<4x256xf32>
    %c16 = arith.constant 16 : index
    %c0_46 = arith.constant 0 : index
    %117 = vector.load %arg7[%c16, %c0_46] : memref<36x256xf32, #tpu.memory_space<vmem>>, vector<4x256xf32>
    tpu.vector_store %arg7[%c16, %c0_46], %116 {strides = array<i32>} : memref<36x256xf32, #tpu.memory_space<vmem>>, vector<4x256xf32>,
    %c0_47 = arith.constant 0 : index
    %c129 = arith.constant 129 : index
    %118 = vector.load %arg6[%c0_47, %c129] : memref<4x512xf32, #tpu.memory_space<vmem>>, vector<4x256xf32>
    %c1_i32_48 = arith.constant 1 : i32
    %119 = vector.broadcast %c1_i32_48 : i32 to vector<1x256xi32>
    %120 = arith.addi %68, %119 : vector<1x256xi32>
    %c0_i32_49 = arith.constant 0 : i32
    %121 = vector.broadcast %c0_i32_49 : i32 to vector<1x256xi32>
    %122 = arith.cmpi sge, %120, %121 : vector<1x256xi32>
    %c1_i32_50 = arith.constant 1 : i32
    %123 = vector.broadcast %c1_i32_50 : i32 to vector<1x256xi32>
    %124 = arith.addi %68, %123 : vector<1x256xi32>
    %c16_i32_51 = arith.constant 16 : i32
    %125 = vector.broadcast %c16_i32_51 : i32 to vector<1x256xi32>
    %126 = arith.cmpi slt, %124, %125 : vector<1x256xi32>
    %127 = arith.andi %122, %126 : vector<1x256xi1>
    %128 = arith.extui %127 : vector<1x256xi1> to vector<1x256xi32>
    %129 = arith.sitofp %128 : vector<1x256xi32> to vector<1x256xf32>
    %130 = vector.broadcast %129 : vector<1x256xf32> to vector<4x256xf32>
    %131 = arith.mulf %118, %130 : vector<4x256xf32>
    %c20 = arith.constant 20 : index
    %c0_52 = arith.constant 0 : index
    %132 = vector.load %arg7[%c20, %c0_52] : memref<36x256xf32, #tpu.memory_space<vmem>>, vector<4x256xf32>
    tpu.vector_store %arg7[%c20, %c0_52], %131 {strides = array<i32>} : memref<36x256xf32, #tpu.memory_space<vmem>>, vector<4x256xf32>,
    %c0_53 = arith.constant 0 : index
    %c143 = arith.constant 143 : index
    %133 = vector.load %arg6[%c0_53, %c143] : memref<4x512xf32, #tpu.memory_space<vmem>>, vector<4x256xf32>
    %c-1_i32_54 = arith.constant -1 : i32
    %134 = vector.broadcast %c-1_i32_54 : i32 to vector<1x256xi32>
    %135 = arith.addi %68, %134 : vector<1x256xi32>
    %c0_i32_55 = arith.constant 0 : i32
    %136 = vector.broadcast %c0_i32_55 : i32 to vector<1x256xi32>
    %137 = arith.cmpi sge, %135, %136 : vector<1x256xi32>
    %c-1_i32_56 = arith.constant -1 : i32
    %138 = vector.broadcast %c-1_i32_56 : i32 to vector<1x256xi32>
    %139 = arith.addi %68, %138 : vector<1x256xi32>
    %c16_i32_57 = arith.constant 16 : i32
    %140 = vector.broadcast %c16_i32_57 : i32 to vector<1x256xi32>
    %141 = arith.cmpi slt, %139, %140 : vector<1x256xi32>
    %142 = arith.andi %137, %141 : vector<1x256xi1>
    %143 = arith.extui %142 : vector<1x256xi1> to vector<1x256xi32>
    %144 = arith.sitofp %143 : vector<1x256xi32> to vector<1x256xf32>
    %145 = vector.broadcast %144 : vector<1x256xf32> to vector<4x256xf32>
    %146 = arith.mulf %133, %145 : vector<4x256xf32>
    %c24 = arith.constant 24 : index
    %c0_58 = arith.constant 0 : index
    %147 = vector.load %arg7[%c24, %c0_58] : memref<36x256xf32, #tpu.memory_space<vmem>>, vector<4x256xf32>
    tpu.vector_store %arg7[%c24, %c0_58], %146 {strides = array<i32>} : memref<36x256xf32, #tpu.memory_space<vmem>>, vector<4x256xf32>,
    %c0_59 = arith.constant 0 : index
    %c144 = arith.constant 144 : index
    %148 = vector.load %arg6[%c0_59, %c144] : memref<4x512xf32, #tpu.memory_space<vmem>>, vector<4x256xf32>
    %c28 = arith.constant 28 : index
    %c0_60 = arith.constant 0 : index
    %149 = vector.load %arg7[%c28, %c0_60] : memref<36x256xf32, #tpu.memory_space<vmem>>, vector<4x256xf32>
    tpu.vector_store %arg7[%c28, %c0_60], %148 {strides = array<i32>} : memref<36x256xf32, #tpu.memory_space<vmem>>, vector<4x256xf32>,
    %c0_61 = arith.constant 0 : index
    %c145 = arith.constant 145 : index
    %150 = vector.load %arg6[%c0_61, %c145] : memref<4x512xf32, #tpu.memory_space<vmem>>, vector<4x256xf32>
    %c1_i32_62 = arith.constant 1 : i32
    %151 = vector.broadcast %c1_i32_62 : i32 to vector<1x256xi32>
    %152 = arith.addi %68, %151 : vector<1x256xi32>
    %c0_i32_63 = arith.constant 0 : i32
    %153 = vector.broadcast %c0_i32_63 : i32 to vector<1x256xi32>
    %154 = arith.cmpi sge, %152, %153 : vector<1x256xi32>
    %c1_i32_64 = arith.constant 1 : i32
    %155 = vector.broadcast %c1_i32_64 : i32 to vector<1x256xi32>
    %156 = arith.addi %68, %155 : vector<1x256xi32>
    %c16_i32_65 = arith.constant 16 : i32
    %157 = vector.broadcast %c16_i32_65 : i32 to vector<1x256xi32>
    %158 = arith.cmpi slt, %156, %157 : vector<1x256xi32>
    %159 = arith.andi %154, %158 : vector<1x256xi1>
    %160 = arith.extui %159 : vector<1x256xi1> to vector<1x256xi32>
    %161 = arith.sitofp %160 : vector<1x256xi32> to vector<1x256xf32>
    %162 = vector.broadcast %161 : vector<1x256xf32> to vector<4x256xf32>
    %163 = arith.mulf %150, %162 : vector<4x256xf32>
    %c32 = arith.constant 32 : index
    %c0_66 = arith.constant 0 : index
    %164 = vector.load %arg7[%c32, %c0_66] : memref<36x256xf32, #tpu.memory_space<vmem>>, vector<4x256xf32>
    tpu.vector_store %arg7[%c32, %c0_66], %163 {strides = array<i32>} : memref<36x256xf32, #tpu.memory_space<vmem>>, vector<4x256xf32>,
    %c0_67 = arith.constant 0 : index
    %c0_68 = arith.constant 0 : index
    %165 = vector.load %arg3[%c0_67, %c0_68] : memref<4x36xbf16, #tpu.memory_space<vmem>>, vector<4x36xbf16>
    %c0_69 = arith.constant 0 : index
    %c0_70 = arith.constant 0 : index
    %166 = vector.load %arg7[%c0_69, %c0_70] : memref<36x256xf32, #tpu.memory_space<vmem>>, vector<36x256xf32>
    %167 = arith.truncf %166 : vector<36x256xf32> to vector<36x256xbf16>
    %cst_71 = arith.constant dense<0.000000e+00> : vector<4x256xf32>
    %168 = tpu.matmul %165, %167, %cst_71 {dimension_numbers = #tpu.dot_dimension_numbers<[1], [0], [0], [1], [0, 0, 1, 1], [], []>} : vector<4x36xbf16>, vector<36x256xbf16>, vector<4x256xf32> -> vector<4x256xf32>
    %cst_72 = arith.constant dense<0.000000e+00> : vector<4xf32>
    %169 = vector.multi_reduction <add>, %168, %cst_72 [1] : vector<4x256xf32> to vector<4xf32>
    %170 = vector.shape_cast %169 : vector<4xf32> to vector<4x1xf32>
    %cst_73 = arith.constant 3.906250e-03 : f32
    %171 = vector.broadcast %cst_73 : f32 to vector<4x1xf32>
    %172 = arith.mulf %170, %171 : vector<4x1xf32>
    %173 = arith.mulf %168, %168 : vector<4x256xf32>
    %cst_74 = arith.constant dense<0.000000e+00> : vector<4xf32>
    %174 = vector.multi_reduction <add>, %173, %cst_74 [1] : vector<4x256xf32> to vector<4xf32>
    %175 = vector.shape_cast %174 : vector<4xf32> to vector<4x1xf32>
    %cst_75 = arith.constant 3.906250e-03 : f32
    %176 = vector.broadcast %cst_75 : f32 to vector<4x1xf32>
    %177 = arith.mulf %175, %176 : vector<4x1xf32>
    %178 = arith.mulf %172, %172 : vector<4x1xf32>
    %179 = arith.subf %177, %178 : vector<4x1xf32>
    %cst_76 = arith.constant 0.000000e+00 : f32
    %180 = vector.broadcast %cst_76 : f32 to vector<4x1xf32>
    %181 = arith.maximumf %179, %180 : vector<4x1xf32>
    %182 = vector.broadcast %172 : vector<4x1xf32> to vector<4x256xf32>
    %183 = arith.subf %168, %182 : vector<4x256xf32>
    %cst_77 = arith.constant 9.99999974E-6 : f32
    %184 = vector.broadcast %cst_77 : f32 to vector<4x1xf32>
    %185 = arith.addf %181, %184 : vector<4x1xf32>
    %186 = math.rsqrt %185 : vector<4x1xf32>
    %187 = vector.broadcast %186 : vector<4x1xf32> to vector<4x256xf32>
    %188 = arith.mulf %183, %187 : vector<4x256xf32>
    %cst_78 = arith.constant 0.000000e+00 : f32
    %189 = vector.broadcast %cst_78 : f32 to vector<4x256xf32>
    %190 = arith.maximumf %188, %189 : vector<4x256xf32>
    %c0_79 = arith.constant 0 : index
    %c0_80 = arith.constant 0 : index
    %191 = vector.load %arg4[%c0_79, %c0_80] : memref<16x4xbf16, #tpu.memory_space<vmem>>, vector<16x4xbf16>
    %192 = arith.truncf %190 : vector<4x256xf32> to vector<4x256xbf16>
    %cst_81 = arith.constant dense<0.000000e+00> : vector<16x256xf32>
    %193 = tpu.matmul %191, %192, %cst_81 {dimension_numbers = #tpu.dot_dimension_numbers<[1], [0], [0], [1], [0, 0, 1, 1], [], []>} : vector<16x4xbf16>, vector<4x256xbf16>, vector<16x256xf32> -> vector<16x256xf32>
    %cst_82 = arith.constant dense<0.000000e+00> : vector<16xf32>
    %194 = vector.multi_reduction <add>, %193, %cst_82 [1] : vector<16x256xf32> to vector<16xf32>
    %195 = vector.shape_cast %194 : vector<16xf32> to vector<16x1xf32>
    %cst_83 = arith.constant 3.906250e-03 : f32
    %196 = vector.broadcast %cst_83 : f32 to vector<16x1xf32>
    %197 = arith.mulf %195, %196 : vector<16x1xf32>
    %198 = arith.mulf %193, %193 : vector<16x256xf32>
    %cst_84 = arith.constant dense<0.000000e+00> : vector<16xf32>
    %199 = vector.multi_reduction <add>, %198, %cst_84 [1] : vector<16x256xf32> to vector<16xf32>
    %200 = vector.shape_cast %199 : vector<16xf32> to vector<16x1xf32>
    %cst_85 = arith.constant 3.906250e-03 : f32
    %201 = vector.broadcast %cst_85 : f32 to vector<16x1xf32>
    %202 = arith.mulf %200, %201 : vector<16x1xf32>
    %203 = arith.mulf %197, %197 : vector<16x1xf32>
    %204 = arith.subf %202, %203 : vector<16x1xf32>
    %cst_86 = arith.constant 0.000000e+00 : f32
    %205 = vector.broadcast %cst_86 : f32 to vector<16x1xf32>
    %206 = arith.maximumf %204, %205 : vector<16x1xf32>
    %207 = vector.broadcast %197 : vector<16x1xf32> to vector<16x256xf32>
    %208 = arith.subf %193, %207 : vector<16x256xf32>
    %cst_87 = arith.constant 9.99999974E-6 : f32
    %209 = vector.broadcast %cst_87 : f32 to vector<16x1xf32>
    %210 = arith.addf %206, %209 : vector<16x1xf32>
    %211 = math.rsqrt %210 : vector<16x1xf32>
    %212 = vector.broadcast %211 : vector<16x1xf32> to vector<16x256xf32>
    %213 = arith.mulf %208, %212 : vector<16x256xf32>
    %cst_88 = arith.constant 0.000000e+00 : f32
    %214 = vector.broadcast %cst_88 : f32 to vector<16x256xf32>
    %215 = arith.maximumf %213, %214 : vector<16x256xf32>
    %216 = arith.addf %215, %25 : vector<16x256xf32>
    %cst_89 = arith.constant 0.000000e+00 : f32
    %217 = vector.broadcast %cst_89 : f32 to vector<16x256xf32>
    %218 = arith.maximumf %216, %217 : vector<16x256xf32>
    %c0_90 = arith.constant 0 : index
    %c0_91 = arith.constant 0 : index
    %c0_92 = arith.constant 0 : index
    %219 = vector.load %arg5[%c0_90, %c0_91, %c0_92] : memref<1x16x256xf32, #tpu.memory_space<vmem>>, vector<1x16x256xf32>
    %220 = vector.shape_cast %219 : vector<1x16x256xf32> to vector<16x256xf32>
    %221 = vector.shape_cast %218 : vector<16x256xf32> to vector<1x16x256xf32>
    tpu.vector_store %arg5[%c0_90, %c0_91, %c0_92], %221 {strides = array<i32>} : memref<1x16x256xf32, #tpu.memory_space<vmem>>, vector<1x16x256xf32>,
    return
  }
  func.func @transform_0(%arg0: i32) -> (i32, i32, i32) {
    %c0_i32 = arith.constant 0 : i32
    %c0_i32_0 = arith.constant 0 : i32
    %c0_i32_1 = arith.constant 0 : i32
    return %arg0, %c0_i32, %c0_i32_0 : i32, i32, i32
  }
  func.func @transform_1(%arg0: i32) -> (i32, i32) {
    %c0_i32 = arith.constant 0 : i32
    %c0_i32_0 = arith.constant 0 : i32
    %c0_i32_1 = arith.constant 0 : i32
    return %c0_i32, %c0_i32_0 : i32, i32
  }
  func.func @transform_2(%arg0: i32) -> (i32, i32) {
    %c0_i32 = arith.constant 0 : i32
    %c0_i32_0 = arith.constant 0 : i32
    %c0_i32_1 = arith.constant 0 : i32
    return %c0_i32, %c0_i32_0 : i32, i32
  }
  func.func @transform_3(%arg0: i32) -> (i32, i32) {
    %c0_i32 = arith.constant 0 : i32
    %c0_i32_0 = arith.constant 0 : i32
    %c0_i32_1 = arith.constant 0 : i32
    return %c0_i32, %c0_i32_0 : i32, i32
  }
  func.func @transform_4(%arg0: i32) -> (i32, i32, i32) {
    %c0_i32 = arith.constant 0 : i32
    %c0_i32_0 = arith.constant 0 : i32
    %c0_i32_1 = arith.constant 0 : i32
    return %arg0, %c0_i32, %c0_i32_0 : i32, i32, i32
  }
}

</mosaic_0001>

<bundles_post_ra>
// kernel: basic_block_forward.1
= control target key start
LH: loop header
LB: loop body
LE: loop exit
PB: predicated region body
PF: predicated region fallthrough
CT: control target
= control target key end

     0   :  { %s985_s15 = smov 0   ;;  %s1119_s0 = inlined_call_operand.vmem [shape: f32[2,4,256], index: 0, kind: input, shape index: {}]   ;;  %s1120_s1 = inlined_call_operand.vmem [shape: bf16[20,4], index: 1, kind: input, shape index: {}]   ;;  %s1121_s2 = inlined_call_operand.vmem [shape: bf16[4,36], index: 2, kind: input, shape index: {}]   ;;  %s1122_s3 = inlined_call_operand.vmem [shape: bf16[16,4], index: 3, kind: input, shape index: {}]   ;;  %s1123_s4 = inlined_call_operand.vmem [shape: f32[2,16,256], index: 4, kind: output, shape index: {}]  }
   0x1 LB: > { %s874_s16 = sadd.s32 4294967295, %s948_s15   ;;  %p878_p0 = scmp.ge.s32.totalorder %s948_s15, 1  ;;  %s948_s15 = sphi %s985_s15, %s14_s15  }
   0x2   : > { %p162_p1 = scmp.lt.s32.totalorder %s948_s15, 3 }
   0x4   : > { %p163_p2 = pnand %p878_p0, %p162_p1 }
   0x5   : > { %p188_p3 = scmp.lt.s32.totalorder (!%p163_p2), %s874_s16, 1  ;;  %v950_v0 = vmov (!%p163_p2), 0   ;;  %vm223_vm0 = vcmask (!%p163_p2), 1041408   ;;  %v922_v6 = vld [vmem:[%s1120_s1 + $0x8] ss:$0 sps:$4 sm:$0x33] (!%p163_p2)   ;;  %v352_v7 = vlaneseq (!%p163_p2) }
   0x6   : > { %166 = sbr.rel (%p163_p2) target bundleno = 1380 (0x564), region = 36  ;;  %272 = vmatprep.mubr.bf16.mxu1 (!%p163_p2), %v950_v0  ;;  %262 = vmatprep.mubr.bf16.mxu0 (!%p163_p2), %v950_v0  ;;  %vm216_vm1 = vcmask (!%p163_p2), 31744   ;;  %v951_v8 = vmov (!%p163_p2), 0.0   ;;  %s952_s23 = smov (!%p163_p2), 111   ;;  %vm319_vm6 = vcmask (!%p163_p2), 1043456   ;;  %vm475_vm7 = vcmask (!%p163_p2), 121856  }
   0x7   : > { %345 = vst [vmem:[#allocation2] sm:$0xff] (!%p163_p2), %v951_v8  ;;  %346 = vst [vmem:[#allocation2 + $0x8] sm:$0xff] (!%p163_p2), %v951_v8  ;;  %v353_v9 = vand.u32 (!%p163_p2), 127, %v352_v7  ;;  %s953_s24 = smov (!%p163_p2), 113   ;;  %s954_s25 = smov (!%p163_p2), 15   ;;  %vm503_vm8 = vcmask (!%p163_p2), 7168  }
   0x8   : > { %s955_s26 = smov (!%p163_p2), 1   ;;  %s956_s27 = smov (!%p163_p2), 17   ;;  %vm487_vm9 = vcmask (!%p163_p2), 1039360   ;;  %vm399_vm10 = vcmask (!%p163_p2), 908288   ;;  %vm460_vm11 = vcmask (!%p163_p2), 924672   ;;  %vm414_vm12 = vcmask (!%p163_p2), 138240  }
   0x9   : > { %v354_v10 = vadd.s32 (!%p163_p2), 128, %v353_v9  ;;  %v359_v11 = vand.u32 (!%p163_p2), 15, %v353_v9  ;;  %s957_s28 = smov (!%p163_p2), 127   ;;  %s958_s29 = smov (!%p163_p2), 112   ;;  %vm433_vm13 = vcmask (!%p163_p2), 130048   ;;  %vm579_vm14 = vcmask (!%p163_p2), 916480  }
   0xa   : > { %s959_s30 = smov (!%p163_p2), 16   ;;  %vm628_vm15 = vcmask (!%p163_p2), 293888  }
   0xb   : > { %v366_v12 = vand.u32 (!%p163_p2), 15, %v354_v10  ;;  %v381_v13 = vadd.s32 (!%p163_p2), 4294967295, %v359_v11  ;;  %v442_v14 = vadd.s32 (!%p163_p2), 1, %v359_v11 }
   0xd   : > { %s1125_s16 = smov (!%p188_p3, %s874_s16), 1  ;;  %v382_v15 = vadd.s32 4294967295, %v366_v12  ;;  %vm383_vm2 = vcmp.ge.s32.totalorder %v381_v13, 0  ;;  %v443_v16 = vadd.s32 1, %v366_v12  ;;  %vm446_vm3 = vcmp.lt.s32.totalorder %v442_v14, 16 }
   0xe   : > { %s899_s17 = sshll.u32 %s1125_s16, 3  ;;  %v888_v17 = vsel %vm383_vm2, 1.0, %v951_v8  ;;  %v890_v19 = vsel %vm446_vm3, 1.0, %v951_v8  ;;  %v517_v40 = vld [vmem:[#allocation2 + $0xc] sm:$0xf]  ;;  %s900_s11 = sshll.u32 %s1125_s16, 5 }
   0xf   : > { %s192_s20 = scalar_lea.vmem %s1119_s0, %s899_s17  ;;  %vm384_vm4 = vcmp.ge.s32.totalorder %v382_v15, 0  ;;  %vm447_vm5 = vcmp.lt.s32.totalorder %v443_v16, 16  ;;  %v543_v44 = vld [vmem:[#allocation2 + $0xc] sm:$0xf]  ;;  %s197_s14 = scalar_lea.vmem %s1123_s4, %s900_s11 }
  0x10   : > { %v199_v1 = vld [vmem:[%s192_s20] sm:$0xff]  ;;  %v889_v18 = vsel %vm384_vm4, 1.0, %v951_v8  ;;  %v891_v20 = vsel %vm447_vm5, 1.0, %v951_v8  ;;  %v923_v48 = vld [vmem:[#allocation2 + $0xc] ss:$0 sps:$4 sm:$0xff]  }
  0x11   : > { %v201_v2 = vcombine.high %v199_v1, %v199_v1  ;;  %v203_v3 = vpack.c.bf16 %v199_v1, %v199_v1  ;;  %v395_v21 = vcombine.low %v888_v17, %v889_v18  ;;  %v456_v22 = vcombine.low %v890_v19, %v891_v20 }
  0x13   : > { %v204_v4 = vpack.c.bf16 %v201_v2, %v201_v2  ;;  %v225_v5 = vsel %vm223_vm0, %v203_v3, 0  ;;  %396 = vrot.lane.b32.xlu1 %v395_v21, %s952_s23 }
  0x15   : > { %901 = vmatprep.subr.msk.bf16.mxu1 %vm223_vm0, %v204_v4  ;;  %885 = vmatprep.subr.msk.bf16.mxu0 %vm223_vm0, %v204_v4 }
  0x16   : > { %902 = vmatpush1.bf16.msra.mxu1 %v225_v5  ;;  %231 = vmatpush1.bf16.msra.mxu0 %v225_v5 }
  0x17   : > { %457 = vrot.lane.b32.xlu1 %v456_v22, %s953_s24 }
  0x19   : > { %887 = vmatmul.mubr.msk.bf16.vlgmr.msra.gmra.mrb[0].mxu1 %vm216_vm1, %v922_v6 }
  0x1a   : > { %670 = vmatprep.mubr.bf16.mxu1 %v950_v0 }
  0x1b   : > { %544 = vrot.lane.b32.xlu1 %v395_v21, %s954_s25 }
  0x1f   : > { %518 = vrot.lane.b32.xlu1 %v456_v22, %s955_s26 }
  0x23   : > { %588 = vrot.lane.b32.xlu1 %v456_v22, %s956_s27 }
  0x85   : > { %v1018_v35 = vpop.permute.xlu1 %396 }
  0x86   : > { %v398_v12 = vrot.slane %v1018_v35, 4 }
  0x88   : > { %v400_v20 = vsel %vm399_vm10, %v398_v12, %v1018_v35 }
  0x89   : > { %v1020_v36 = vpop.permute.xlu1 %457 }
  0x8a   : > { %v459_v9 = vrot.slane %v1020_v36, 4 }
  0x8d   : > { %v545_v37 = vpop.permute.xlu1 %544 }
  0x8e   : > { %v546_v43 = vrot.slane %v545_v37, 4 }
  0x90   : > { %v547_v45 = vsel %vm475_vm7, %v546_v43, %v545_v37  ;;  %v551_v46 = vmul.f32 %v546_v43, %v543_v44 }
  0x91   : > { %v519_v38 = vpop.permute.xlu1 %518 }
  0x92   : > { %v520_v39 = vrot.slane %v519_v38, 4 }
  0x94   : > { %v525_v41 = vmul.f32 %v520_v39, %v517_v40  ;;  %v521_v47 = vsel %vm503_vm8, %v520_v39, %v519_v38 }
  0x95   : > { %v589_v22 = vpop.permute.xlu1 %588 }
  0x96   : > { %v529_v42 = vcombine.low %v525_v41, %v525_v41 }
  0xec   : > { %v274_v23 = vpop.f32.mrb[0].mxu1 }
  0xed   : > { %v326_v24 = vmul.f32 %v274_v23, %v274_v23  ;;  %v276_v25 = vpop.f32.mrb[1].mxu1  ;;  %v320_v26 = vsel %vm319_vm6, %v274_v23, 0.0 }
  0xee   : > { %v327_v27 = vmul.f32 %v276_v25, %v276_v25  ;;  %v278_v28 = vpop.f32.mrb[2].mxu1  ;;  %v321_v29 = vsel %vm319_vm6, %v276_v25, 0.0 }
  0xef   : > { %v279_v30 = vpop.f32.mrb[3].mxu1  ;;  %v322_v31 = vadd.f32 %v321_v29, %v320_v26  ;;  %v328_v32 = vsel %vm319_vm6, %v326_v24, 0.0  ;;  %v461_v24 = vsel %vm460_vm11, %v459_v9, %v1020_v36  ;;  %v587_v29 = vld [vmem:[#allocation2 + $0xc] sm:$0xf] }
  0xf0   : > { %v329_v33 = vsel %vm319_vm6, %v327_v27, 0.0 }
  0xf1   : > { %323 = vadd.xlane.f32.xlu0 %v322_v31  ;;  %v330_v34 = vadd.f32 %v329_v33, %v328_v32 }
  0xf5   : > { %331 = vadd.xlane.f32.xlu0 %v330_v34 }
 0x10b   : > { %484 = vrot.lane.b32.xlu0 %v395_v21, %s957_s28 }
 0x10f   : > { %534 = vrot.lane.b32.xlu0 %v529_v42, %s957_s28 }
 0x113   : > { %559 = vrot.lane.b32.xlu0 %v551_v46, %s953_s24 }
 0x117   : > { %577 = vrot.lane.b32.xlu0 %v923_v48, %s958_s29 }
 0x17e   : > { %v324_v49 = vpop.xlane.xlu0 %323 }
 0x17f   : > { %v325_v50 = vmul.f32 0.00390625, %v324_v49 }
 0x181   : > { %v334_v52 = vmul.f32 %v325_v50, %v325_v50  ;;  %v337_v57 = vsub.f32 %v274_v23, %v325_v50  ;;  %v338_v58 = vsub.f32 %v276_v25, %v325_v50  ;;  %v590_v25 = vrot.slane %v589_v22, 4 }
 0x182   : > { %v332_v51 = vpop.xlane.xlu0 %331 }
 0x183   : > { %v333_v53 = vmul.f32 0.00390625, %v332_v51  ;;  %v591_v28 = vsel %vm414_vm12, %v590_v25, %v589_v22  ;;  %v595_v31 = vmul.f32 %v590_v25, %v587_v29 }
 0x185   : > { %v335_v54 = vsub.f32 %v333_v53, %v334_v52 }
 0x186   : > { %v485_v6 = vpop.permute.xlu0 %484 }
 0x187   : > { %v336_v55 = vmax.f32 %v335_v54, 0.0  ;;  %v486_v11 = vrot.slane %v485_v6, 4 }
 0x189   : > { %v339_v56 = vadd.f32 1e-05, %v336_v55  ;;  %v488_v15 = vsel %vm487_vm9, %v486_v11, %v485_v6 }
 0x18a   : > { %v535_v38 = vpop.permute.xlu0 %534 }
 0x18b   : > { %928 = vrsqrt.f32 %v339_v56 }
 0x18e   : > { %v560_v39 = vpop.permute.xlu0 %559 }
 0x192   : > { %v578_v40 = vpop.permute.xlu0 %577 }
 0x195   : > { %v929_v59 = vpop.eup %928 }
 0x196   : > { %v341_v60 = vmul.f32 %v929_v59, %v337_v57  ;;  %v342_v61 = vmul.f32 %v929_v59, %v338_v58 }
 0x198   : > { %v343_v62 = vmax.f32 %v341_v60, 0.0  ;;  %v344_v63 = vmax.f32 %v342_v61, 0.0 }
 0x19a   : > { %v349_v1 = vcombine.low %v343_v62, %v344_v63  ;;  %v940_v4 = vcombine.low %v344_v63, %v344_v63  ;;  %v941_v32 = vcombine.low %v343_v62, %v343_v62 }
 0x19c   : > { %351 = vst [vmem:[#allocation2 + $0x4] sm:$0xff] %v349_v1  ;;  %v550_v2 = vmul.f32 %v547_v45, %v349_v1  ;;  %v524_v3 = vmul.f32 %v521_v47, %v349_v1  ;;  %514 = vst [vmem:[#allocation3 + $0x20] sm:$0xf] %v349_v1  ;;  %v594_v30 = vmul.f32 %v591_v28, %v349_v1 }
 0x19d   : > { %515 = vst [vmem:[#allocation3 + $0x28] sm:$0xf] %v940_v4 }
 0x19e   : > { %v554_v35 = vcombine.high %v550_v2, %v550_v2  ;;  %v528_v36 = vcombine.low %v524_v3, %v524_v3  ;;  %v598_v37 = vcombine.high %v594_v30, %v594_v30 }
 0x1a3   : > { %v379_v5 = vld [vmem:[#allocation2] sm:$0xff]  ;;  %v925_v7 = vld [vmem:[#allocation2 + $0x8] ss:$0 sps:$4 sm:$0xff]  }
 0x1a4   : > { %429 = vrot.lane.b32.xlu1 %v379_v5, %s959_s30  ;;  %v441_v8 = vld [vmem:[#allocation2 + $0x8] sm:$0xf]  ;;  %431 = vrot.lane.b32.xlu0 %v925_v7, %s959_s30  ;;  %v425_v16 = vcombine.low %v379_v5, %v379_v5  ;;  %v491_v18 = vmul.f32 %v488_v15, %v379_v5  ;;  %v403_v21 = vmul.f32 %v400_v20, %v379_v5 }
 0x1a5   : > { %v380_v10 = vld [vmem:[#allocation2 + $0x8] sm:$0xf]  ;;  %v465_v13 = vmul.f32 %v459_v9, %v441_v8  ;;  %v464_v26 = vmul.f32 %v461_v24, %v379_v5 }
 0x1a6   : > { %v404_v14 = vmul.f32 %v398_v12, %v380_v10  ;;  %v483_v17 = vld [vmem:[#allocation2 + $0x8] sm:$0xf]  ;;  %v495_v27 = vcombine.low %v491_v18, %v491_v18  ;;  %v407_v33 = vcombine.high %v403_v21, %v403_v21 }
 0x1a7   : > { %v492_v19 = vmul.f32 %v486_v11, %v483_v17  ;;  %v468_v34 = vcombine.high %v464_v26, %v464_v26 }
 0x1a8   : > { %575 = vrot.lane.b32.xlu1 %v349_v1, %s958_s29  ;;  %473 = vrot.lane.b32.xlu0 %v465_v13, %s954_s25 }
 0x1a9   : > { %v496_v23 = vcombine.low %v492_v19, %v492_v19 }
 0x1ac   : > { %412 = vrot.lane.b32.xlu1 %v404_v14, %s956_s27  ;;  %427 = vrot.lane.b32.xlu0 %v425_v16, %s959_s30 }
 0x1b0   : > { %499 = vrot.lane.b32.xlu1 %v491_v18, %s955_s26  ;;  %555 = vrot.lane.b32.xlu0 %v550_v2, %s953_s24 }
 0x1b4   : > { %408 = vrot.lane.b32.xlu1 %v403_v21, %s956_s27  ;;  %501 = vrot.lane.b32.xlu0 %v496_v23, %s955_s26 }
 0x1b8   : > { %469 = vrot.lane.b32.xlu1 %v464_v26, %s954_s25  ;;  %497 = vrot.lane.b32.xlu0 %v495_v27, %s955_s26 }
 0x1bc   : > { %532 = vrot.lane.b32.xlu1 %v524_v3, %s957_s28  ;;  %599 = vrot.lane.b32.xlu0 %v594_v30, %s952_s23 }
 0x1c0   : > { %573 = vrot.lane.b32.xlu1 %v941_v32, %s958_s29  ;;  %603 = vrot.lane.b32.xlu0 %v595_v31, %s952_s23  ;;  %v611_v32 = vld [vmem:[%s1121_s2] sm:$0x3] }
 0x1c4   : > { %410 = vrot.lane.b32.xlu1 %v407_v33, %s956_s27  ;;  %v926_v33 = vld [vmem:[%s1120_s1] sm:$0xff]  }
 0x1c5   : > { %886 = vmatmul.mubr.msk.bf16.vlgmr.msra.gmra.mrb[0].mxu0 %vm216_vm1, %v926_v33 }
 0x1c6   : > { %754 = vmatprep.mubr.bf16.mxu0 %v950_v0 }
 0x1c8   : > { %471 = vrot.lane.b32.xlu1 %v468_v34, %s954_s25 }
 0x1cc   : > { %557 = vrot.lane.b32.xlu1 %v554_v35, %s953_s24 }
 0x1d0   : > { %530 = vrot.lane.b32.xlu1 %v528_v36, %s957_s28 }
 0x1d4   : > { %601 = vrot.lane.b32.xlu1 %v598_v37, %s952_s23 }
 0x216   : > { %v430_v41 = vpop.permute.xlu1 %429  ;;  %v432_v42 = vpop.permute.xlu0 %431 }
 0x217   : > { %v435_v43 = vsel %vm433_vm13, %v430_v41, %v432_v42 }
 0x218   : > { %439 = vst [vmem:[#allocation3 + $0x8] sm:$0xf0] %v435_v43 }
 0x21a   : > { %v576_v44 = vpop.permute.xlu1 %575  ;;  %v474_v46 = vpop.permute.xlu0 %473 }
 0x21b   : > { %v581_v45 = vsel %vm579_vm14, %v576_v44, %v578_v40 }
 0x21c   : > { %585 = vst [vmem:[#allocation3 + $0x38] sm:$0xf0] %v581_v45 }
 0x21e   : > { %v413_v47 = vpop.permute.xlu1 %412  ;;  %v428_v48 = vpop.permute.xlu0 %427 }
 0x21f   : > { %v434_v49 = vsel %vm433_vm13, %v428_v48, %v430_v41 }
 0x220   : > { %438 = vst [vmem:[#allocation3] sm:$0xf0] %v434_v49 }
 0x222   : > { %v500_v50 = vpop.permute.xlu1 %499  ;;  %v556_v51 = vpop.permute.xlu0 %555 }
 0x226   : > { %v409_v52 = vpop.permute.xlu1 %408  ;;  %v502_v53 = vpop.permute.xlu0 %501 }
 0x227   : > { %v505_v54 = vsel %vm503_vm8, %v500_v50, %v502_v53 }
 0x228   : > { %509 = vst [vmem:[#allocation3 + $0x18] sm:$0xf0] %v505_v54 }
 0x22a   : > { %v470_v55 = vpop.permute.xlu1 %469  ;;  %v498_v56 = vpop.permute.xlu0 %497 }
 0x22b   : > { %v504_v57 = vsel %vm503_vm8, %v498_v56, %v500_v50 }
 0x22c   : > { %508 = vst [vmem:[#allocation3 + $0x10] sm:$0xf0] %v504_v57 }
 0x22e   : > { %v533_v58 = vpop.permute.xlu1 %532  ;;  %v600_v8 = vpop.permute.xlu0 %599 }
 0x22f   : > { %v537_v59 = vsel %vm487_vm9, %v533_v58, %v535_v38 }
 0x230   : > { %541 = vst [vmem:[#allocation3 + $0x28] sm:$0xf0] %v537_v59 }
 0x232   : > { %v574_v60 = vpop.permute.xlu1 %573  ;;  %v604_v17 = vpop.permute.xlu0 %603 }
 0x233   : > { %v580_v61 = vsel %vm579_vm14, %v574_v60, %v576_v44 }
 0x234   : > { %584 = vst [vmem:[#allocation3 + $0x30] sm:$0xf0] %v580_v61 }
 0x236   : > { %v411_v62 = vpop.permute.xlu1 %410 }
 0x237   : > { %v415_v63 = vsel %vm414_vm12, %v409_v52, %v411_v62  ;;  %v416_v1 = vsel %vm414_vm12, %v411_v62, %v413_v47  ;;  %v617_v21 = vld [vmem:[#allocation3 + $0x28] sm:$0xff] }
 0x238   : > { %419 = vst [vmem:[#allocation3] sm:$0xf] %v415_v63  ;;  %420 = vst [vmem:[#allocation3 + $0x8] sm:$0xf] %v416_v1 }
 0x23a   : > { %v472_v2 = vpop.permute.xlu1 %471 }
 0x23b   : > { %v476_v3 = vsel %vm475_vm7, %v470_v55, %v472_v2  ;;  %v477_v4 = vsel %vm475_vm7, %v472_v2, %v474_v46 }
 0x23c   : > { %480 = vst [vmem:[#allocation3 + $0x10] sm:$0xf] %v476_v3  ;;  %481 = vst [vmem:[#allocation3 + $0x18] sm:$0xf] %v477_v4 }
 0x23e   : > { %v558_v5 = vpop.permute.xlu1 %557 }
 0x23f   : > { %v561_v6 = vsel %vm460_vm11, %v556_v51, %v558_v5  ;;  %v562_v7 = vsel %vm460_vm11, %v558_v5, %v560_v39  ;;  %v613_v10 = vld [vmem:[#allocation3 + $0x8] sm:$0xff]  ;;  %v612_v13 = vld [vmem:[#allocation3] sm:$0xff] }
 0x240   : > { %565 = vst [vmem:[#allocation3 + $0x30] sm:$0xf] %v561_v6  ;;  %566 = vst [vmem:[#allocation3 + $0x38] sm:$0xf] %v562_v7  ;;  %v927_v6 = vld [vmem:[%s1122_s3] sm:$0xff]  }
 0x242   : > { %v531_v9 = vpop.permute.xlu1 %530 }
 0x243   : > { %v536_v11 = vsel %vm487_vm9, %v531_v9, %v533_v58  ;;  %v615_v12 = vld [vmem:[#allocation3 + $0x18] sm:$0xff]  ;;  %v614_v14 = vld [vmem:[#allocation3 + $0x10] sm:$0xff] }
 0x244   : > { %540 = vst [vmem:[#allocation3 + $0x20] sm:$0xf0] %v536_v11  ;;  %v623_v15 = vpack.c.bf16 %v615_v12, %v613_v10  ;;  %v622_v16 = vpack.c.bf16 %v614_v14, %v612_v13 }
 0x246   : > { %v602_v18 = vpop.permute.xlu1 %601  ;;  %638 = vmatprep.subr.bf16.mxu1 %v623_v15 }
 0x247   : > { %v605_v19 = vsel %vm399_vm10, %v600_v8, %v602_v18  ;;  %v606_v20 = vsel %vm399_vm10, %v602_v18, %v604_v17  ;;  %639 = vmatpush1.bf16.msra.mxu1 %v622_v16  ;;  %v619_v22 = vld [vmem:[#allocation3 + $0x38] sm:$0xff]  ;;  %v618_v25 = vld [vmem:[#allocation3 + $0x30] sm:$0xff] }
 0x248   : > { %609 = vst [vmem:[#allocation3 + $0x40] sm:$0xf] %v605_v19  ;;  %610 = vst [vmem:[#allocation3 + $0x48] sm:$0xf] %v606_v20  ;;  %v625_v23 = vpack.c.bf16 %v619_v22, %v617_v21 }
 0x24a   : > { %640 = vmatprep.subr.bf16.mxu1 %v625_v23 }
 0x24b   : > { %v616_v24 = vld [vmem:[#allocation3 + $0x20] sm:$0xff] }
 0x24c   : > { %v624_v26 = vpack.c.bf16 %v618_v25, %v616_v24 }
 0x24e   : > { %641 = vmatpush1.bf16.msra.mxu1 %v624_v26 }
 0x24f   : > { %v621_v27 = vld [vmem:[#allocation3 + $0x48] sm:$0xf]  ;;  %v620_v28 = vld [vmem:[#allocation3 + $0x40] sm:$0xf] }
 0x250   : > { %v627_v29 = vpack.c.bf16 %v621_v27, %v621_v27  ;;  %v626_v30 = vpack.c.bf16 %v620_v28, %v620_v28 }
 0x252   : > { %892 = vmatprep.subr.msk.bf16.mxu1 %vm223_vm0, %v627_v29  ;;  %v633_v31 = vsel %vm223_vm0, %v626_v30, 0 }
 0x253   : > { %643 = vmatpush1.bf16.msra.mxu1 %v633_v31 }
 0x256   : > { %893 = vmatmul.mubr.msk.bf16.vlgmr.msra.gmra.mrb[4].mxu1 %vm628_vm15, %v611_v32 }
 0x298   : > { %v1082_v46 = vpop.f32.mrb[0].mxu0 }
 0x299   : > { %v1084_v0 = vpop.f32.mrb[1].mxu0  ;;  %v289_v7 = vmul.f32 %v1082_v46, %v1082_v46 }
 0x29a   : > { %v1086_v47 = vpop.f32.mrb[2].mxu0  ;;  %v281_v48 = vadd.f32 %v1084_v0, %v1082_v46  ;;  %v290_v8 = vmul.f32 %v1084_v0, %v1084_v0 }
 0x29b   : > { %v1090_v49 = vpop.f32.mrb[3].mxu0  ;;  %v291_v9 = vmul.f32 %v1086_v47, %v1086_v47 }
 0x29c   : > { %v284_v50 = vadd.f32 %v1090_v49, %v1086_v47  ;;  %v292_v10 = vmul.f32 %v1090_v49, %v1090_v49  ;;  %v293_v11 = vadd.f32 %v290_v8, %v289_v7 }
 0x29e   : > { %v296_v12 = vadd.f32 %v292_v10, %v291_v9 }
 0x329   : > { %v672_v34 = vpop.f32.mrb[4].mxu1 }
 0x32a   : > { %v685_v35 = vmul.f32 %v672_v34, %v672_v34  ;;  %v674_v36 = vpop.f32.mrb[5].mxu1  ;;  %v679_v37 = vsel %vm319_vm6, %v672_v34, 0.0 }
 0x32b   : > { %v686_v38 = vmul.f32 %v674_v36, %v674_v36  ;;  %v676_v39 = vpop.f32.mrb[6].mxu1  ;;  %v680_v40 = vsel %vm319_vm6, %v674_v36, 0.0 }
 0x32c   : > { %v677_v41 = vpop.f32.mrb[7].mxu1  ;;  %v681_v42 = vadd.f32 %v680_v40, %v679_v37  ;;  %v687_v43 = vsel %vm319_vm6, %v685_v35, 0.0 }
 0x32d   : > { %v688_v44 = vsel %vm319_vm6, %v686_v38, 0.0 }
 0x32e   : > { %682 = vadd.xlane.f32.xlu1 %v681_v42  ;;  %v689_v45 = vadd.f32 %v688_v44, %v687_v43 }
 0x330   : > { %690 = vadd.xlane.f32.xlu0 %v689_v45 }
 0x332   : > { %285 = vadd.xlane.f32.xlu1 %v284_v50 }
 0x334   : > { %282 = vadd.xlane.f32.xlu0 %v281_v48 }
 0x3bb   : > { %v683_v51 = vpop.xlane.xlu1 %682 }
 0x3bc   : > { %v684_v52 = vmul.f32 0.00390625, %v683_v51 }
 0x3bd   : > { %v691_v53 = vpop.xlane.xlu0 %690 }
 0x3be   : > { %v692_v54 = vmul.f32 0.00390625, %v691_v53  ;;  %v693_v55 = vmul.f32 %v684_v52, %v684_v52  ;;  %v696_v59 = vsub.f32 %v672_v34, %v684_v52  ;;  %v697_v60 = vsub.f32 %v674_v36, %v684_v52 }
 0x3bf   : > { %v286_v26 = vpop.xlane.xlu1 %285 }
 0x3c0   : > { %v694_v56 = vsub.f32 %v692_v54, %v693_v55  ;;  %v288_v39 = vmul.f32 0.00390625, %v286_v26 }
 0x3c1   : > { %v283_v25 = vpop.xlane.xlu0 %282 }
 0x3c2   : > { %v695_v57 = vmax.f32 %v694_v56, 0.0  ;;  %v287_v35 = vmul.f32 0.00390625, %v283_v25  ;;  %v302_v45 = vmul.f32 %v288_v39, %v288_v39  ;;  %v309_v10 = vsub.f32 %v1086_v47, %v288_v39 }
 0x3c4   : > { %v698_v58 = vadd.f32 1e-05, %v695_v57  ;;  %v301_v43 = vmul.f32 %v287_v35, %v287_v35 }
 0x3c6   : > { %930 = vrsqrt.f32 %v698_v58 }
 0x3d0   : > { %v931_v61 = vpop.eup %930 }
 0x3d1   : > { %v701_v62 = vmul.f32 %v931_v61, %v697_v60  ;;  %v700_v63 = vmul.f32 %v931_v61, %v696_v59 }
 0x3d3   : > { %v703_v1 = vmax.f32 %v701_v62, 0.0  ;;  %v702_v2 = vmax.f32 %v700_v63, 0.0 }
 0x3d5   : > { %v707_v3 = vpack.c.bf16 %v703_v1, %v703_v1  ;;  %v706_v4 = vpack.c.bf16 %v702_v2, %v702_v2 }
 0x3d7   : > { %895 = vmatprep.subr.msk.bf16.mxu0 %vm223_vm0, %v707_v3  ;;  %v717_v5 = vsel %vm223_vm0, %v706_v4, 0 }
 0x3d8   : > { %723 = vmatpush1.bf16.msra.mxu0 %v717_v5  ;;  %v307_v5 = vsub.f32 %v1082_v46, %v287_v35 }
 0x3db   : > { %896 = vmatmul.mubr.msk.bf16.vlgmr.msra.gmra.mrb[4].mxu0 %vm216_vm1, %v927_v6  ;;  %v308_v6 = vsub.f32 %v1084_v0, %v287_v35 }
 0x4ae   : > { %v756_v13 = vpop.f32.mrb[4].mxu0 }
 0x4af   : > { %v758_v14 = vpop.f32.mrb[5].mxu0  ;;  %v773_v15 = vmul.f32 %v756_v13, %v756_v13 }
 0x4b0   : > { %v760_v16 = vpop.f32.mrb[6].mxu0  ;;  %v765_v17 = vadd.f32 %v758_v14, %v756_v13  ;;  %v774_v18 = vmul.f32 %v758_v14, %v758_v14 }
 0x4b1   : > { %v762_v19 = vpop.f32.mrb[7].mxu0  ;;  %v775_v20 = vmul.f32 %v760_v16, %v760_v16 }
 0x4b2   : > { %v776_v21 = vmul.f32 %v762_v19, %v762_v19  ;;  %766 = vadd.xlane.f32.xlu0 %v765_v17  ;;  %v768_v22 = vadd.f32 %v762_v19, %v760_v16  ;;  %v777_v23 = vadd.f32 %v774_v18, %v773_v15 }
 0x4b4   : > { %769 = vadd.xlane.f32.xlu1 %v768_v22  ;;  %v780_v24 = vadd.f32 %v776_v21, %v775_v20 }
 0x4b6   : > { %778 = vadd.xlane.f32.xlu0 %v777_v23 }
 0x4b8   : > { %781 = vadd.xlane.f32.xlu1 %v780_v24 }
 0x4ba   : > { %294 = vadd.xlane.f32.xlu0 %v293_v11  ;;  %v310_v11 = vsub.f32 %v1090_v49, %v288_v39 }
 0x4bc   : > { %297 = vadd.xlane.f32.xlu1 %v296_v12 }
 0x53f   : > { %v767_v27 = vpop.xlane.xlu0 %766 }
 0x540   : > { %v771_v28 = vmul.f32 0.00390625, %v767_v27 }
 0x541   : > { %v770_v29 = vpop.xlane.xlu1 %769 }
 0x542   : > { %v772_v30 = vmul.f32 0.00390625, %v770_v29  ;;  %v785_v32 = vmul.f32 %v771_v28, %v771_v28  ;;  %v791_v60 = vsub.f32 %v756_v13, %v771_v28  ;;  %v792_v61 = vsub.f32 %v758_v14, %v771_v28 }
 0x543   : > { %v779_v31 = vpop.xlane.xlu0 %778 }
 0x544   : > { %v783_v33 = vmul.f32 0.00390625, %v779_v31  ;;  %v786_v37 = vmul.f32 %v772_v30, %v772_v30  ;;  %v793_v63 = vsub.f32 %v760_v16, %v772_v30  ;;  %v794_v1 = vsub.f32 %v762_v19, %v772_v30 }
 0x545   : > { %v782_v34 = vpop.xlane.xlu1 %781 }
 0x546   : > { %v787_v36 = vsub.f32 %v783_v33, %v785_v32  ;;  %v784_v38 = vmul.f32 0.00390625, %v782_v34 }
 0x547   : > { %v295_v40 = vpop.xlane.xlu0 %294 }
 0x548   : > { %v789_v41 = vmax.f32 %v787_v36, 0.0  ;;  %v788_v42 = vsub.f32 %v784_v38, %v786_v37  ;;  %v299_v44 = vmul.f32 0.00390625, %v295_v40 }
 0x549   : > { %v298_v48 = vpop.xlane.xlu1 %297 }
 0x54a   : > { %v795_v50 = vadd.f32 1e-05, %v789_v41  ;;  %v790_v51 = vmax.f32 %v788_v42, 0.0  ;;  %v303_v52 = vsub.f32 %v299_v44, %v301_v43  ;;  %v300_v53 = vmul.f32 0.00390625, %v298_v48 }
 0x54c   : > { %932 = vrsqrt.f32 %v795_v50  ;;  %v796_v54 = vadd.f32 1e-05, %v790_v51  ;;  %v305_v55 = vmax.f32 %v303_v52, 0.0  ;;  %v304_v56 = vsub.f32 %v300_v53, %v302_v45 }
 0x54e   : > { %934 = vrsqrt.f32 %v796_v54  ;;  %v311_v57 = vadd.f32 1e-05, %v305_v55  ;;  %v306_v58 = vmax.f32 %v304_v56, 0.0 }
 0x550   : > { %936 = vrsqrt.f32 %v311_v57  ;;  %v312_v59 = vadd.f32 1e-05, %v306_v58 }
 0x552   : > { %938 = vrsqrt.f32 %v312_v59 }
 0x556   : > { %v933_v62 = vpop.eup %932 }
 0x557   : > { %v799_v2 = vmul.f32 %v933_v62, %v791_v60  ;;  %v800_v3 = vmul.f32 %v933_v62, %v792_v61 }
 0x558   : > { %v935_v4 = vpop.eup %934 }
 0x559   : > { %v801_v7 = vmul.f32 %v935_v4, %v793_v63  ;;  %v802_v8 = vmul.f32 %v935_v4, %v794_v1  ;;  %v803_v12 = vmax.f32 %v799_v2, 0.0  ;;  %v804_v13 = vmax.f32 %v800_v3, 0.0 }
 0x55a   : > { %v937_v9 = vpop.eup %936 }
 0x55b   : > { %v315_v14 = vmul.f32 %v937_v9, %v307_v5  ;;  %v316_v15 = vmul.f32 %v937_v9, %v308_v6  ;;  %v805_v17 = vmax.f32 %v801_v7, 0.0  ;;  %v806_v18 = vmax.f32 %v802_v8, 0.0 }
 0x55c   : > { %v939_v16 = vpop.eup %938 }
 0x55d   : > { %v807_v19 = vadd.f32 %v803_v12, %v315_v14  ;;  %v808_v20 = vadd.f32 %v804_v13, %v316_v15  ;;  %v317_v46 = vmul.f32 %v939_v16, %v309_v10  ;;  %v318_v21 = vmul.f32 %v939_v16, %v310_v11 }
 0x55f   : > { %v811_v0 = vmax.f32 %v807_v19, 0.0  ;;  %v812_v47 = vmax.f32 %v808_v20, 0.0  ;;  %v809_v22 = vadd.f32 %v805_v17, %v317_v46  ;;  %v810_v49 = vadd.f32 %v806_v18, %v318_v21 }
 0x561   : > { %815 = vst [vmem:[%s197_s14] sm:$0xff] %v811_v0  ;;  %816 = vst [vmem:[%s197_s14 + $0x8] sm:$0xff] %v812_v47  ;;  %v813_v23 = vmax.f32 %v809_v22, 0.0  ;;  %v814_v24 = vmax.f32 %v810_v49, 0.0 }
 0x563   : > { %817 = vst [vmem:[%s197_s14 + $0x10] sm:$0xff] %v813_v23  ;;  %818 = vst [vmem:[%s197_s14 + $0x18] sm:$0xff] %v814_v24 }
 0x564 PF: > { %s14_s15 = sadd.s32 1, %s948_s15  }
 0x565   : > { %p11_p4 = scmp.ge.s32.totalorder %s14_s15, 4  }
 0x567   :  { %13 = sbr.rel (!%p11_p4) target bundleno = 1 (0x1), region = 66 }

</bundles_post_ra>
